<compile_context>
chip_gen: v7x
topology: tpu7x:2x2x1
jax: 0.10.0
libtpu: 0.0.40
codegen_flags: <defaults>
</compile_context>

<pallas_src>
import functools

import jax
import jax.numpy as jnp
from jax.experimental import pallas as pl
from jax.experimental.pallas import tpu as pltpu


# ---------------------------------------------------------------------------
# Kernels
# ---------------------------------------------------------------------------
def _fused_kernel(x_ref, hones_ref, scale_ref, out_ref, *, tm, mode):
    """out = scale*(x_even - x_odd) - H_ones for one (tb, tm) output tile.

    x_ref holds the matching (tb, 2*tm) raw-measurement tile (interleaved
    y+/y- along the lane axis), hones_ref a (1, tm) row, scale_ref a (1,)
    SMEM scalar.  The deinterleave's VPU/XLU cost is hidden behind the DMA.
    """
    scale = scale_ref[0]
    if mode == "value_slice":
        v = x_ref[...]
        even = v[:, 0::2]
        odd = v[:, 1::2]
    else:  # "ref_stride": stride-2 loads straight from the VMEM ref.
        even = x_ref[:, pl.ds(0, tm, 2)]
        odd = x_ref[:, pl.ds(1, tm, 2)]
    diff = even.astype(jnp.float32) - odd.astype(jnp.float32)
    out = diff * scale - hones_ref[...].astype(jnp.float32)
    out_ref[...] = out.astype(out_ref.dtype)


def _affine_kernel(diff_ref, hones_ref, scale_ref, out_ref):
    """Fallback hot loop: out = scale*diff - H_ones on a (tb, tm) tile."""
    out = (diff_ref[...].astype(jnp.float32) * scale_ref[0]
           - hones_ref[...].astype(jnp.float32))
    out_ref[...] = out.astype(out_ref.dtype)


# ---------------------------------------------------------------------------
# Tile selection (pure Python, O(1))
# ---------------------------------------------------------------------------
def _round_up(x, m):
    return ((x + m - 1) // m) * m


def _pick_tiles(B, M, itemsize, tb_max, tm_max):
    """Lane-dense, cdiv-friendly tiles.

    * tm: prefer a single full-M (rounded to 128) block -> contiguous rows in
      HBM; split only when M alone exceeds tm_max.
    * tb: as large as an ~8 MiB double-buffered budget allows (fits default
      scoped VMEM on v5e=16, v6e=32, v7x=32 MiB), clamped to the batch.
    * if the grid would collapse to one step, split the batch in two so v7x's
      second TensorCore is not idle.
    """
    sub = 8 * max(1, 4 // itemsize)               # sublane unit: 8 f32, 16 bf16
    tm = min(_round_up(M, 128), _round_up(tm_max, 128))
    budget = 8 << 20                              # bytes, double-buffered
    # fused per-step buffers ~ (2*tm + tm) * tb elems, double buffered
    tb_fit = max(sub, (budget // (6 * tm * itemsize)) // sub * sub)
    tb = min(_round_up(tb_max, sub), tb_fit, _round_up(B, sub))
    n_m = -(-M // tm)
    n_b = -(-B // tb)
    if n_m * n_b < 2 and B >= 2 * sub:
        tb = max(sub, _round_up(-(-B // 2), sub))
    return tb, tm


# ---------------------------------------------------------------------------
# pallas_call wrappers
# ---------------------------------------------------------------------------
@functools.partial(jax.jit, static_argnums=(3, 4, 5))
def _fused_impl(x2, h_ones, scale, tb, tm, mode):
    B, two_m = x2.shape
    M = two_m // 2
    grid = (pl.cdiv(M, tm), pl.cdiv(B, tb))       # M outer, batch inner
    itemsize = jnp.dtype(x2.dtype).itemsize
    kernel = functools.partial(_fused_kernel, tm=tm, mode=mode)
    return pl.pallas_call(
        kernel,
        out_shape=jax.ShapeDtypeStruct((B, M), x2.dtype),
        grid=grid,
        in_specs=[
            pl.BlockSpec((tb, 2 * tm), lambda m, b: (b, m)),    # raw x tile
            pl.BlockSpec((1, tm), lambda m, b: (0, m)),         # H_ones (m-only)
            pl.BlockSpec(memory_space=pltpu.MemorySpace.SMEM),  # scale scalar
        ],
        out_specs=pl.BlockSpec((tb, tm), lambda m, b: (b, m)),
        compiler_params=pltpu.CompilerParams(
            dimension_semantics=("parallel", "parallel")),
        cost_estimate=pl.CostEstimate(
            flops=3 * B * M, transcendentals=0,
            bytes_accessed=itemsize * (2 * B * M + B * M + M)),
    )(x2, h_ones, scale)


@functools.partial(jax.jit, static_argnums=(3, 4))
def _twopass_impl(x2, h_ones, scale, tb, tm):
    # TODO(synk): fallback only -- materializes `diff` in HBM (one extra write
    # + read of B*M floats) when the in-kernel lane deinterleave fails to lower.
    B, two_m = x2.shape
    M = two_m // 2
    diff = x2[:, 0::2] - x2[:, 1::2]              # single fused XLA pass
    grid = (pl.cdiv(M, tm), pl.cdiv(B, tb))
    itemsize = jnp.dtype(x2.dtype).itemsize
    return pl.pallas_call(
        _affine_kernel,
        out_shape=jax.ShapeDtypeStruct((B, M), x2.dtype),
        grid=grid,
        in_specs=[
            pl.BlockSpec((tb, tm), lambda m, b: (b, m)),
            pl.BlockSpec((1, tm), lambda m, b: (0, m)),
            pl.BlockSpec(memory_space=pltpu.MemorySpace.SMEM),
        ],
        out_specs=pl.BlockSpec((tb, tm), lambda m, b: (b, m)),
        compiler_params=pltpu.CompilerParams(
            dimension_semantics=("parallel", "parallel")),
        cost_estimate=pl.CostEstimate(
            flops=2 * B * M, transcendentals=0,
            bytes_accessed=itemsize * (2 * B * M + M)),
    )(diff, h_ones, scale)


_DEINTERLEAVE_MODE = None   # chosen once per process, then cached


def split_poisson_forward(x, h_ones, alpha, *, tb_max=256, tm_max=2048):
    """JAX/Pallas equivalent of SplitPoisson.forward.

    Args:
      x:      (*, 2M) measurements with interleaved (y+, y-) samples.
      h_ones: (1, M)  buffer  H @ ones(N, 1), transposed  (i.e. H1).
      alpha:  maximum image intensity (runtime scalar, no recompile per value).

    Returns:
      (*, M) preprocessed measurements:  2*(y+ - y-)/alpha - H_ones.
    """
    global _DEINTERLEAVE_MODE
    orig_shape = x.shape
    two_m = orig_shape[-1]
    if two_m % 2 != 0:
        raise ValueError(f"last dimension must be even (got {two_m})")
    M = two_m // 2
    h_ones = jnp.asarray(h_ones).reshape(1, M)
    x2 = x.reshape(-1, two_m)                     # merge leading dims (free)
    B = x2.shape[0]
    scale = jnp.asarray([2.0 / float(alpha)], dtype=jnp.float32)

    itemsize = jnp.dtype(x2.dtype).itemsize
    tb, tm = _pick_tiles(B, M, itemsize, int(tb_max), int(tm_max))

    out2 = None
    if _DEINTERLEAVE_MODE is None:                # decide once, then cache
        ref = None
        for mode in ("value_slice", "ref_stride"):
            try:
                cand = jax.block_until_ready(
                    _fused_impl(x2, h_ones, scale, tb, tm, mode))
            except Exception:                     # lowering / compile failed
                continue
            if ref is None:
                ref = ((x2[:, 0::2].astype(jnp.float32)
                        - x2[:, 1::2].astype(jnp.float32))
                       * (2.0 / float(alpha))
                       - h_ones.astype(jnp.float32)).astype(x2.dtype)
            if bool(jnp.allclose(cand, ref, rtol=1e-4, atol=1e-4)):
                _DEINTERLEAVE_MODE = mode
                out2 = cand
                break
        if _DEINTERLEAVE_MODE is None:
            _DEINTERLEAVE_MODE = "twopass"

    if out2 is None:
        if _DEINTERLEAVE_MODE == "twopass":
            out2 = _twopass_impl(x2, h_ones, scale, tb, tm)
        else:
            out2 = _fused_impl(x2, h_ones, scale, tb, tm, _DEINTERLEAVE_MODE)
    return out2.reshape(orig_shape[:-1] + (M,))


if __name__ == "__main__":
    key = jax.random.PRNGKey(0)
    k_h, k_x, k_h2, k_x2 = jax.random.split(key, 4)

    # Case 1: mirrors the SplitPoisson docstring example (H: 400 x 32*32, x: 10 x 800).
    B, M, N = 10, 400, 32 * 32
    alpha = 10.0
    H = jax.random.uniform(k_h, (M, N), dtype=jnp.float32)
    H_ones = (H @ jnp.ones((N, 1), jnp.float32)).T                   # (1, M)
    x = jax.random.uniform(k_x, (B, 2 * M), dtype=jnp.float32)

    m = jax.block_until_ready(split_poisson_forward(x, H_ones, alpha))
    ref = 2.0 * (x[..., 0::2] - x[..., 1::2]) / alpha - H_ones
    assert m.shape == (B, M)
    assert jnp.allclose(m, ref, atol=1e-5, rtol=1e-5)

    # Case 2: extra leading dims + small tile caps -> multi-block grid (4 x 2),
    # exercising H_ones reuse across inner batch steps and the batch split.
    M2 = 512
    h2 = jax.random.uniform(k_h2, (1, M2), dtype=jnp.float32)
    x2 = jax.random.uniform(k_x2, (2, 8, 2 * M2), dtype=jnp.float32)
    m2 = jax.block_until_ready(
        split_poisson_forward(x2, h2, alpha, tb_max=8, tm_max=128))
    ref2 = 2.0 * (x2[..., 0::2] - x2[..., 1::2]) / alpha - h2
    assert m2.shape == (2, 8, M2)
    assert jnp.allclose(m2, ref2, atol=1e-5, rtol=1e-5)

    print("KERNEL_OK")
</pallas_src>

<mosaic_0001>
module attributes {stable_mosaic.version = 11 : i64} {
  func.func @_fused_kernel(%arg0: i32, %arg1: i32, %arg2: memref<16x1024xf32, #tpu.memory_space<vmem>>, %arg3: memref<1x512xf32, #tpu.memory_space<vmem>>, %arg4: memref<1xf32, #tpu.memory_space<smem>>, %arg5: memref<16x512xf32, #tpu.memory_space<vmem>>) attributes {dimension_semantics = [#tpu.dimension_semantics<parallel>, #tpu.dimension_semantics<parallel>], iteration_bounds = array<i64: 1, 1>, scalar_prefetch = 0 : i64, scratch_operands = 0 : i64, tpu.core_type = #tpu.core_type<tc>, window_params = [{transform_indices = @transform_0, window_bounds = array<i64: 16, 1024>}, {transform_indices = @transform_1, window_bounds = array<i64: 1, 512>}, {transform_indices = @transform_2, window_bounds = array<i64: 1>}, {transform_indices = @transform_3, window_bounds = array<i64: 16, 512>}]} {
    %c0 = arith.constant 0 : index
    %0 = memref.load %arg4[%c0] : memref<1xf32, #tpu.memory_space<smem>>
    %c0_0 = arith.constant 0 : index
    %c0_1 = arith.constant 0 : index
    %1 = tpu.strided_load %arg2[%c0_0, %c0_1] {strides = array<i32: 1, 2>} : memref<16x1024xf32, #tpu.memory_space<vmem>>, vector<16x512xf32>
    %c0_2 = arith.constant 0 : index
    %c1 = arith.constant 1 : index
    %2 = tpu.strided_load %arg2[%c0_2, %c1] {strides = array<i32: 1, 2>} : memref<16x1024xf32, #tpu.memory_space<vmem>>, vector<16x512xf32>
    %3 = arith.subf %1, %2 : vector<16x512xf32>
    %4 = vector.broadcast %0 : f32 to vector<16x512xf32>
    %5 = arith.mulf %3, %4 : vector<16x512xf32>
    %c0_3 = arith.constant 0 : index
    %c0_4 = arith.constant 0 : index
    %6 = vector.load %arg3[%c0_3, %c0_4] : memref<1x512xf32, #tpu.memory_space<vmem>>, vector<1x512xf32>
    %7 = vector.broadcast %6 : vector<1x512xf32> to vector<16x512xf32>
    %8 = arith.subf %5, %7 : vector<16x512xf32>
    %c0_5 = arith.constant 0 : index
    %c0_6 = arith.constant 0 : index
    %9 = vector.load %arg5[%c0_5, %c0_6] : memref<16x512xf32, #tpu.memory_space<vmem>>, vector<16x512xf32>
    tpu.vector_store %arg5[%c0_5, %c0_6], %8 {strides = array<i32>} : memref<16x512xf32, #tpu.memory_space<vmem>>, vector<16x512xf32>,
    return
  }
  func.func @transform_0(%arg0: i32, %arg1: i32) -> (i32, i32) {
    %c0_i32 = arith.constant 0 : i32
    return %arg1, %arg0 : i32, i32
  }
  func.func @transform_1(%arg0: i32, %arg1: i32) -> (i32, i32) {
    %c0_i32 = arith.constant 0 : i32
    %c0_i32_0 = arith.constant 0 : i32
    return %c0_i32, %arg0 : i32, i32
  }
  func.func @transform_2(%arg0: i32, %arg1: i32) -> i32 {
    %c0_i32 = arith.constant 0 : i32
    %c0_i32_0 = arith.constant 0 : i32
    return %c0_i32 : i32
  }
  func.func @transform_3(%arg0: i32, %arg1: i32) -> (i32, i32) {
    %c0_i32 = arith.constant 0 : i32
    return %arg1, %arg0 : i32, i32
  }
}

module attributes {stable_mosaic.version = 11 : i64} {
  func.func @_affine_kernel(%arg0: i32, %arg1: i32, %arg2: memref<16x512xf32, #tpu.memory_space<vmem>>, %arg3: memref<1x512xf32, #tpu.memory_space<vmem>>, %arg4: memref<1xf32, #tpu.memory_space<smem>>, %arg5: memref<16x512xf32, #tpu.memory_space<vmem>>) attributes {dimension_semantics = [#tpu.dimension_semantics<parallel>, #tpu.dimension_semantics<parallel>], iteration_bounds = array<i64: 1, 1>, scalar_prefetch = 0 : i64, scratch_operands = 0 : i64, tpu.core_type = #tpu.core_type<tc>, window_params = [{transform_indices = @transform_0, window_bounds = array<i64: 16, 512>}, {transform_indices = @transform_1, window_bounds = array<i64: 1, 512>}, {transform_indices = @transform_2, window_bounds = array<i64: 1>}, {transform_indices = @transform_3, window_bounds = array<i64: 16, 512>}]} {
    %c0 = arith.constant 0 : index
    %c0_0 = arith.constant 0 : index
    %0 = vector.load %arg2[%c0, %c0_0] : memref<16x512xf32, #tpu.memory_space<vmem>>, vector<16x512xf32>
    %c0_1 = arith.constant 0 : index
    %1 = memref.load %arg4[%c0_1] : memref<1xf32, #tpu.memory_space<smem>>
    %2 = vector.broadcast %1 : f32 to vector<16x512xf32>
    %3 = arith.mulf %0, %2 : vector<16x512xf32>
    %c0_2 = arith.constant 0 : index
    %c0_3 = arith.constant 0 : index
    %4 = vector.load %arg3[%c0_2, %c0_3] : memref<1x512xf32, #tpu.memory_space<vmem>>, vector<1x512xf32>
    %5 = vector.broadcast %4 : vector<1x512xf32> to vector<16x512xf32>
    %6 = arith.subf %3, %5 : vector<16x512xf32>
    %c0_4 = arith.constant 0 : index
    %c0_5 = arith.constant 0 : index
    %7 = vector.load %arg5[%c0_4, %c0_5] : memref<16x512xf32, #tpu.memory_space<vmem>>, vector<16x512xf32>
    tpu.vector_store %arg5[%c0_4, %c0_5], %6 {strides = array<i32>} : memref<16x512xf32, #tpu.memory_space<vmem>>, vector<16x512xf32>,
    return
  }
  func.func @transform_0(%arg0: i32, %arg1: i32) -> (i32, i32) {
    %c0_i32 = arith.constant 0 : i32
    return %arg1, %arg0 : i32, i32
  }
  func.func @transform_1(%arg0: i32, %arg1: i32) -> (i32, i32) {
    %c0_i32 = arith.constant 0 : i32
    %c0_i32_0 = arith.constant 0 : i32
    return %c0_i32, %arg0 : i32, i32
  }
  func.func @transform_2(%arg0: i32, %arg1: i32) -> i32 {
    %c0_i32 = arith.constant 0 : i32
    %c0_i32_0 = arith.constant 0 : i32
    return %c0_i32 : i32
  }
  func.func @transform_3(%arg0: i32, %arg1: i32) -> (i32, i32) {
    %c0_i32 = arith.constant 0 : i32
    return %arg1, %arg0 : i32, i32
  }
}

</mosaic_0001>

<bundles_post_ra>
// kernel: sub.1
= control target key start
LH: loop header
LB: loop body
LE: loop exit
PB: predicated region body
PF: predicated region fallthrough
CT: control target
= control target key end

     0   :  { %s188_s0 = inlined_call_operand.vmem [shape: f32[10,400], index: 0, kind: input, shape index: {}]   ;;  %s189_s1 = inlined_call_operand.vmem [shape: f32[10,400], index: 1, kind: input, shape index: {}]   ;;  %s190_s2 = inlined_call_operand.vmem [shape: f32[10,400], index: 2, kind: output, shape index: {}]  }
   0x1   :  { %v3_v0 = vld [vmem:[%s188_s0] sm:$0xff]  ;;  %v83_v5 = vld [vmem:[%s188_s0 + $0x8] sm:$0xff]  ;;  %v89_v11 = vld [vmem:[%s188_s0 + $0x10] sm:$0xff] }
   0x2   :  { %v4_v1 = vld [vmem:[%s189_s1] sm:$0xff]  ;;  %v84_v6 = vld [vmem:[%s189_s1 + $0x8] sm:$0xff]  ;;  %v90_v13 = vld [vmem:[%s189_s1 + $0x10] sm:$0xff] }
   0x3   :  { %v80_v2 = vld [vmem:[%s188_s0 + $0x20] sm:$0xff]  ;;  %v7_v3 = vsub.f32 %v3_v0, %v4_v1  ;;  %v26_v8 = vsub.f32 %v83_v5, %v84_v6  ;;  %v86_v9 = vld [vmem:[%s188_s0 + $0x28] sm:$0xff]  ;;  %v92_v14 = vld [vmem:[%s188_s0 + $0x30] sm:$0xff]  ;;  %v46_v16 = vsub.f32 %v89_v11, %v90_v13 }
   0x4   :  { %v81_v4 = vld [vmem:[%s189_s1 + $0x20] sm:$0xff]  ;;  %v87_v10 = vld [vmem:[%s189_s1 + $0x28] sm:$0xff]  ;;  %v93_v15 = vld [vmem:[%s189_s1 + $0x30] sm:$0xff] }
   0x5   :  { %v16_v7 = vsub.f32 %v80_v2, %v81_v4  ;;  %9 = vst [vmem:[%s190_s2] sm:$0xff] %v7_v3  ;;  %v36_v12 = vsub.f32 %v86_v9, %v87_v10  ;;  %85 = vst [vmem:[%s190_s2 + $0x8] sm:$0xff] %v26_v8  ;;  %v56_v17 = vsub.f32 %v92_v14, %v93_v15  ;;  %v95_v18 = vld [vmem:[%s188_s0 + $0x18] sm:$0xff] }
   0x6   :  { %v96_v19 = vld [vmem:[%s189_s1 + $0x18] sm:$0xff]  ;;  %91 = vst [vmem:[%s190_s2 + $0x10] sm:$0xff] %v46_v16 }
   0x7   :  { %82 = vst [vmem:[%s190_s2 + $0x20] sm:$0xff] %v16_v7  ;;  %v98_v20 = vld [vmem:[%s188_s0 + $0x38] sm:$0xff]  ;;  %88 = vst [vmem:[%s190_s2 + $0x28] sm:$0xff] %v36_v12  ;;  %v66_v21 = vsub.f32 %v95_v18, %v96_v19 }
   0x8   :  { %v99_v22 = vld [vmem:[%s189_s1 + $0x38] sm:$0xff]  ;;  %94 = vst [vmem:[%s190_s2 + $0x30] sm:$0xff] %v56_v17 }
   0x9   :  { %v76_v23 = vsub.f32 %v98_v20, %v99_v22  ;;  %97 = vst [vmem:[%s190_s2 + $0x18] sm:$0xff] %v66_v21 }
   0xb   :  { %100 = vst [vmem:[%s190_s2 + $0x38] sm:$0xff] %v76_v23 }

// kernel: _twopass_impl.1
= control target key start
LH: loop header
LB: loop body
LE: loop exit
PB: predicated region body
PF: predicated region fallthrough
CT: control target
= control target key end

     0   :  { %v36_v2 = vlaneseq  ;;  %s180_s0 = inlined_call_operand.vmem [shape: f32[10,400], index: 0, kind: input, shape index: {}]   ;;  %s181_s1 = inlined_call_operand.vmem [shape: f32[1,400], index: 1, kind: input, shape index: {}]   ;;  %s182_s2 = inlined_call_operand.<no memory space> [shape: f32[1], index: 2, kind: input, shape index: {}]   ;;  %s183_s3 = inlined_call_operand.hbm [shape: f32[10,400], index: 3, kind: output, shape index: {}]  }
   0x1   :  { %v16_v0 = vld [vmem:[%s180_s0] sm:$0xff]  ;;  %v25_v1 = vstv %s182_s2  ;;  %v17_v3 = vld [vmem:[%s180_s0 + $0x8] sm:$0xff]  ;;  %v18_v4 = vld [vmem:[%s180_s0 + $0x10] sm:$0xff] }
   0x2   :  { %v19_v5 = vld [vmem:[%s180_s0 + $0x18] sm:$0xff]  ;;  %v20_v6 = vld [vmem:[%s180_s0 + $0x20] sm:$0xff]  ;;  %v37_v7 = vshrl.u32 %v36_v2, 7  ;;  %v21_v8 = vld [vmem:[%s180_s0 + $0x28] sm:$0xff]  ;;  %v26_v11 = vmul.f32 %v25_v1, %v16_v0  ;;  %v27_v13 = vmul.f32 %v25_v1, %v17_v3  ;;  %v28_v14 = vmul.f32 %v25_v1, %v18_v4 }
   0x3   :  { %v22_v9 = vld [vmem:[%s180_s0 + $0x30] sm:$0xff]  ;;  %v23_v10 = vld [vmem:[%s180_s0 + $0x38] sm:$0xff]  ;;  %v34_v12 = vld [vmem:[%s181_s1] sm:$0xf]  ;;  %v29_v15 = vmul.f32 %v25_v1, %v19_v5 }
   0x4   :  { %9 = vsyncpa [#allocation4], 0  ;;  %v38_v16 = vsub.s32 0, %v37_v7  ;;  %v42_v17 = vsub.s32 1, %v37_v7  ;;  %v46_v18 = vsub.s32 2, %v37_v7  ;;  %v50_v19 = vsub.s32 3, %v37_v7 }
   0x5   :  { %v30_v20 = vmul.f32 %v25_v1, %v20_v6  ;;  %v31_v21 = vmul.f32 %v25_v1, %v21_v8  ;;  %v32_v22 = vmul.f32 %v25_v1, %v22_v9  ;;  %v33_v23 = vmul.f32 %v25_v1, %v23_v10  ;;  %s115_s0 = smov [#allocation3]  }
   0x6   :  { %v39_v24 = vrot.slane %v34_v12, %v38_v16  ;;  %v43_v25 = vrot.slane %v34_v12, %v42_v17  ;;  %v47_v26 = vrot.slane %v34_v12, %v46_v18  ;;  %v51_v27 = vrot.slane %v34_v12, %v50_v19  ;;  %s77_s4 = sshll.u32 %s115_s0, 4  ;;  %s78_s4 = int_to_ptr.vmem [resolvable:$true] %s77_s4 }
   0x7   :  { %s91_s1 = scalar_lea.vmem %s78_s4, 1024  ;;  %p96_p1 = scmp.lt.s32.totalorder %s78_s4, %s78_s4 }
   0x8   :  { %v56_v28 = vsub.f32 %v26_v11, %v39_v24  ;;  %v57_v29 = vsub.f32 %v27_v13, %v43_v25  ;;  %v58_v30 = vsub.f32 %v28_v14, %v47_v26  ;;  %v59_v31 = vsub.f32 %v29_v15, %v51_v27  ;;  %p92_p0 = scmp.ne.s32.totalorder %s78_s4, %s91_s1  ;;  %p97_p2 = scmp.lt.s32.totalorder %s91_s1, %s91_s1 }
   0x9   :  { %v60_v32 = vsub.f32 %v30_v20, %v39_v24  ;;  %v61_v33 = vsub.f32 %v31_v21, %v43_v25  ;;  %v62_v34 = vsub.f32 %v32_v22, %v47_v26  ;;  %v63_v35 = vsub.f32 %v33_v23, %v51_v27 }
   0xa   :  { %64 = vst [vmem:[#allocation3] sm:$0xff] %v56_v28  ;;  %65 = vst [vmem:[#allocation3 + $0x8] sm:$0xff] %v57_v29  ;;  %p98_p3 = por %p97_p2, %p96_p1 }
   0xb   :  { %66 = vst [vmem:[#allocation3 + $0x10] sm:$0xff] %v58_v30  ;;  %67 = vst [vmem:[#allocation3 + $0x18] sm:$0xff] %v59_v31 }
   0xc   :  { %68 = vst [vmem:[#allocation3 + $0x20] sm:$0xff] %v60_v32  ;;  %69 = vst [vmem:[#allocation3 + $0x28] sm:$0xff] %v61_v33  ;;  %p99_p4 = pnand %p98_p3, %p92_p0 }
   0xd   :  { %70 = vst [vmem:[#allocation3 + $0x30] sm:$0xff] %v62_v34  ;;  %71 = vst [vmem:[#allocation3 + $0x38] sm:$0xff] %v63_v35 }
   0xe   :  { %102 = shalt.err (!%p99_p4)
}
   0xf   :  { %s103_s7 = scalar_lea.hbm %s183_s3, 1024 }
  0x10   :  { %p104_p5 = scmp.ne.s32.totalorder %s183_s3, %s103_s7  ;;  %p107_p6 = scmp.lt.u32.totalorder %s103_s7, %s183_s3 }
  0x12   :  { %p109_p7 = pnand %p107_p6, %p104_p5 }
  0x14   :  { %112 = shalt.err (!%p109_p7)
}
  0x15   :  { %s116_s12 = smov 512   ;;  %s117_s13 = smov 32  }
  0x16   :  { %83 = dma.vmem_to_hbm [thread:$0]  %s78_s4, 1024, %s183_s3, [#allocation4], %s116_s12, %s116_s12, %s117_s13  }
  0x17   :  { %113 = dma.done.wait [#allocation4], 1024  }
  0x18   :  { %114 = vsyncadd [#allocation4], 4294966272 }
  0x19   :  { %87 = vsyncpa [#allocation4], 1 }

</bundles_post_ra>
